<compile_context>
chip_gen: v7x
topology: tpu7x:2x2x1
jax: 0.10.0
libtpu: 0.0.40
codegen_flags: <defaults>
</compile_context>

<pallas_src>
import functools

import jax
import jax.numpy as jnp
import numpy as np
from jax.experimental import pallas as pl
from jax.experimental.pallas import tpu as pltpu


def _leaky_relu(x, slope=0.1):
    return jnp.where(x > 0, x, slope * x)


def _tap_masks(H, W, ksize, pad):
    """(k*k, H*W) float32 validity mask per depthwise tap (emulates zero padding)."""
    h = np.arange(H)[:, None]
    w = np.arange(W)[None, :]
    masks = []
    for kh in range(ksize):
        for kw in range(ksize):
            dh, dw = kh - pad, kw - pad
            valid = (h + dh >= 0) & (h + dh < H) & (w + dw >= 0) & (w + dw < W)
            masks.append(valid.reshape(-1))
    return jnp.asarray(np.stack(masks).astype(np.float32))


def dwconv_kernel(x_ref, wdw_ref, b1_ref, mask_ref, wpw_ref, b2_ref, o_ref,
                  *, ksize, stride, H, W, pad, nb, mxu_dtype):
    """One batch-block (nb images, channel-major) per grid step.

    x_ref   : (C, nb*H*W)        input block, channels on sublanes, spatial on lanes
    wdw_ref : (C, k*k)           depthwise weights with BN scale folded in
    b1_ref  : (C, 1)             folded BN bias after depthwise conv
    mask_ref: (k*k, nb*H*W)      per-tap border validity masks (tiled per image)
    wpw_ref : (Cout, C)          pointwise weights with BN scale folded in (mxu_dtype)
    b2_ref  : (Cout, 1)          folded BN bias after pointwise conv
    o_ref   : (Cout, nb*Ho*Wo)   output block, lane-dense last dim
    """
    C, L = x_ref.shape
    x = x_ref[...]                 # (C, L) f32
    wdw = wdw_ref[...]             # (C, k*k) f32
    masks = mask_ref[...]          # (k*k, L) f32

    # ---- depthwise conv: k*k lane rotations (XLU) + masked VPU accumulation ----
    # accumulator starts at the folded-BN bias; it broadcasts into the first add
    acc = b1_ref[...].astype(jnp.float32)            # (C, 1)
    for kh in range(ksize):
        for kw in range(ksize):
            t = kh * ksize + kw
            d = (kh - pad) * W + (kw - pad)          # flat spatial offset of this tap
            if d == 0:
                # centre tap: no shift, border mask is identically 1 -> skip it
                acc = acc + x * wdw[:, t:t + 1]
            else:
                win = pltpu.roll(x, shift=(-d) % L, axis=1)   # lane rotate on the XLU
                acc = acc + win * (wdw[:, t:t + 1] * masks[t:t + 1, :])

    y1 = _leaky_relu(acc)

    if stride != 1:
        # TODO(synk): use strided lane reads per tap (pl.ds(..., stride=s)) instead of
        # computing the s^2-times-larger full-resolution result and decimating with a
        # non-view reshape; fine at demo scale, wasteful at real resolutions.
        Ho = (H - 1) // stride + 1
        Wo = (W - 1) // stride + 1
        y1 = y1.reshape(C, nb, H, W)[:, :, ::stride, ::stride].reshape(C, nb * Ho * Wo)

    # ---- pointwise 1x1 conv: one (Cout, C) @ (C, nb*Ho*Wo) MXU matmul per step ----
    # bf16 operands (native MXU path on v6e/v7x), f32 accumulation.
    y2 = jnp.dot(wpw_ref[...], y1.astype(mxu_dtype),
                 preferred_element_type=jnp.float32)
    y2 = _leaky_relu(y2 + b2_ref[...])

    o_ref[...] = y2.astype(o_ref.dtype)              # lane-dense (Cout, nb*Ho*Wo) store


def dwconv_forward(x_nchw, params, *, ksize, stride, mxu_dtype=jnp.bfloat16,
                   images_per_step=None):
    """Pallas DWConv forward. x_nchw: (N, C, H, W) float32. Returns (N, Cout, Ho, Wo)."""
    N, C, H, W = x_nchw.shape
    pad = (ksize - 1) // 2
    Ho = (H + 2 * pad - ksize) // stride + 1
    Wo = (W + 2 * pad - ksize) // stride + 1
    Cout = params["pw_w"].shape[0]
    HW = H * W

    # images per grid step: aim for a >=1024-wide lane axis per step (tile sweeps keep
    # improving up to ~1024-wide tiles); must be a divisor of N.
    if images_per_step is None:
        target = max(1, 1024 // HW)
        nb = 1
        for cand in range(min(N, target), 0, -1):
            if N % cand == 0:
                nb = cand
                break
    else:
        nb = images_per_step
    assert N % nb == 0
    steps = N // nb
    L = nb * HW
    Lo = nb * Ho * Wo

    # channel-major layout so each grid step runs one big lane-dense pointwise matmul
    x_cm = jnp.transpose(x_nchw, (1, 0, 2, 3)).reshape(C, N * HW)

    # fold BN scales into conv weights on the host (kernel only adds bias)
    wdw = (params["dw_w"][:, 0].reshape(C, ksize * ksize)
           * params["dw_scale"][:, None]).astype(jnp.float32)          # (C, k*k)
    b1 = params["dw_bias"].reshape(C, 1).astype(jnp.float32)           # (C, 1)
    wpw = (params["pw_w"][:, :, 0, 0]
           * params["pw_scale"][:, None]).astype(mxu_dtype)            # (Cout, C)
    b2 = params["pw_bias"].reshape(Cout, 1).astype(jnp.float32)        # (Cout, 1)

    masks = jnp.tile(_tap_masks(H, W, ksize, pad), (1, nb))            # (k*k, L)

    kernel = functools.partial(dwconv_kernel, ksize=ksize, stride=stride,
                               H=H, W=W, pad=pad, nb=nb, mxu_dtype=mxu_dtype)

    flops = int(N * (HW * ksize * ksize * C * 2 + Ho * Wo * C * Cout * 2))
    bytes_accessed = int(4 * (N * C * HW + N * Cout * Ho * Wo
                              + C * ksize * ksize + C
                              + ksize * ksize * L + Cout)
                         + jnp.dtype(mxu_dtype).itemsize * Cout * C)

    out_cm = pl.pallas_call(
        kernel,
        out_shape=jax.ShapeDtypeStruct((Cout, N * Ho * Wo), x_nchw.dtype),
        grid=(steps,),
        in_specs=[
            pl.BlockSpec((C, L), lambda b: (0, b)),
            # grid-invariant operands (at real sizes: single-buffer via pl.Buffered(1))
            pl.BlockSpec((C, ksize * ksize), lambda b: (0, 0)),
            pl.BlockSpec((C, 1), lambda b: (0, 0)),
            pl.BlockSpec((ksize * ksize, L), lambda b: (0, 0)),
            pl.BlockSpec((Cout, C), lambda b: (0, 0)),
            pl.BlockSpec((Cout, 1), lambda b: (0, 0)),
        ],
        out_specs=pl.BlockSpec((Cout, Lo), lambda b: (0, b)),
        compiler_params=pltpu.CompilerParams(
            dimension_semantics=("parallel",),
            vmem_limit_bytes=32 * 1024 * 1024),
        cost_estimate=pl.CostEstimate(flops=flops, transcendentals=0,
                                      bytes_accessed=bytes_accessed),
    )(x_cm, wdw, b1, masks, wpw, b2)

    # channel-major -> NCHW (wrapper-side layout plumbing)
    return jnp.transpose(out_cm.reshape(Cout, N, Ho, Wo), (1, 0, 2, 3))


def init_params(key, in_channels, out_channels, ksize):
    """Deterministic synthetic parameters (conv weights + eval-mode BN folded to scale/bias)."""
    ks = jax.random.split(key, 10)
    dw_w = 0.1 * jax.random.normal(ks[0], (in_channels, 1, ksize, ksize), jnp.float32)
    pw_w = 0.1 * jax.random.normal(ks[1], (out_channels, in_channels, 1, 1), jnp.float32)
    eps = 1e-3  # BatchNorm2d(eps=0.001)

    def bn_fold(kg, kb, km, kv, c):
        gamma = 1.0 + 0.1 * jax.random.normal(kg, (c,), jnp.float32)
        beta = 0.1 * jax.random.normal(kb, (c,), jnp.float32)
        mean = 0.1 * jax.random.normal(km, (c,), jnp.float32)
        var = jnp.abs(1.0 + 0.1 * jax.random.normal(kv, (c,), jnp.float32))
        scale = gamma / jnp.sqrt(var + eps)
        bias = beta - mean * scale
        return scale, bias

    dw_scale, dw_bias = bn_fold(ks[2], ks[3], ks[4], ks[5], in_channels)
    pw_scale, pw_bias = bn_fold(ks[6], ks[7], ks[8], ks[9], out_channels)
    return dict(dw_w=dw_w, pw_w=pw_w,
                dw_scale=dw_scale, dw_bias=dw_bias,
                pw_scale=pw_scale, pw_bias=pw_bias)


def reference(x_nchw, params, ksize, stride):
    """Pure-JAX reference matching the PyTorch forward (eval-mode BN)."""
    pad = (ksize - 1) // 2
    C = x_nchw.shape[1]
    y = jax.lax.conv_general_dilated(
        x_nchw, params["dw_w"], (stride, stride), ((pad, pad), (pad, pad)),
        dimension_numbers=("NCHW", "OIHW", "NCHW"), feature_group_count=C)
    y = y * params["dw_scale"][None, :, None, None] + params["dw_bias"][None, :, None, None]
    y = jnp.where(y > 0, y, 0.1 * y)
    y = jax.lax.conv_general_dilated(
        y, params["pw_w"], (1, 1), ((0, 0), (0, 0)),
        dimension_numbers=("NCHW", "OIHW", "NCHW"))
    y = y * params["pw_scale"][None, :, None, None] + params["pw_bias"][None, :, None, None]
    y = jnp.where(y > 0, y, 0.1 * y)
    return y


if __name__ == "__main__":
    key = jax.random.PRNGKey(0)
    kx, kp = jax.random.split(key)

    N, Cin, H, W = 2, 8, 16, 16
    Cout, ksize, stride = 16, 3, 1

    x = jax.random.normal(kx, (N, Cin, H, W), jnp.float32)
    params = init_params(kp, Cin, Cout, ksize)
    ref = reference(x, params, ksize, stride)

    # f32 MXU path: tight check of the kernel structure (taps, masks, BN fold, layout).
    out_f32 = jax.block_until_ready(
        dwconv_forward(x, params, ksize=ksize, stride=stride, mxu_dtype=jnp.float32))
    assert out_f32.shape == ref.shape == (N, Cout, H // stride, W // stride)
    np.testing.assert_allclose(np.asarray(out_f32), np.asarray(ref), rtol=1e-4, atol=1e-4)

    # bf16 MXU operands (native v6e/v7x path), f32 accumulation: tolerance matched to
    # bf16 operand rounding (~2^-9 relative per operand).
    out_bf16 = jax.block_until_ready(
        dwconv_forward(x, params, ksize=ksize, stride=stride, mxu_dtype=jnp.bfloat16))
    assert out_bf16.shape == ref.shape
    np.testing.assert_allclose(np.asarray(out_bf16), np.asarray(ref), rtol=2e-2, atol=2e-2)

    print("KERNEL_OK")
</pallas_src>

<mosaic_0001>
module attributes {stable_mosaic.version = 11 : i64} {
  func.func @dwconv_kernel(%arg0: i32, %arg1: memref<8x512xf32, #tpu.memory_space<vmem>>, %arg2: memref<8x9xf32, #tpu.memory_space<vmem>>, %arg3: memref<8x1xf32, #tpu.memory_space<vmem>>, %arg4: memref<9x512xf32, #tpu.memory_space<vmem>>, %arg5: memref<16x8xf32, #tpu.memory_space<vmem>>, %arg6: memref<16x1xf32, #tpu.memory_space<vmem>>, %arg7: memref<16x512xf32, #tpu.memory_space<vmem>>) attributes {dimension_semantics = [#tpu.dimension_semantics<parallel>], iteration_bounds = array<i64: 1>, scalar_prefetch = 0 : i64, scratch_operands = 0 : i64, tpu.core_type = #tpu.core_type<tc>, window_params = [{transform_indices = @transform_0, window_bounds = array<i64: 8, 512>}, {pipeline_mode = #tpu.pipeline_mode<synchronous>, transform_indices = @transform_1, window_bounds = array<i64: 8, 9>}, {pipeline_mode = #tpu.pipeline_mode<synchronous>, transform_indices = @transform_2, window_bounds = array<i64: 8, 1>}, {pipeline_mode = #tpu.pipeline_mode<synchronous>, transform_indices = @transform_3, window_bounds = array<i64: 9, 512>}, {pipeline_mode = #tpu.pipeline_mode<synchronous>, transform_indices = @transform_4, window_bounds = array<i64: 16, 8>}, {pipeline_mode = #tpu.pipeline_mode<synchronous>, transform_indices = @transform_5, window_bounds = array<i64: 16, 1>}, {transform_indices = @transform_6, window_bounds = array<i64: 16, 512>}]} {
    %c0 = arith.constant 0 : index
    %c0_0 = arith.constant 0 : index
    %0 = vector.load %arg1[%c0, %c0_0] : memref<8x512xf32, #tpu.memory_space<vmem>>, vector<8x512xf32>
    %c0_1 = arith.constant 0 : index
    %c0_2 = arith.constant 0 : index
    %1 = vector.load %arg2[%c0_1, %c0_2] : memref<8x9xf32, #tpu.memory_space<vmem>>, vector<8x9xf32>
    %c0_3 = arith.constant 0 : index
    %c0_4 = arith.constant 0 : index
    %2 = vector.load %arg4[%c0_3, %c0_4] : memref<9x512xf32, #tpu.memory_space<vmem>>, vector<9x512xf32>
    %c0_5 = arith.constant 0 : index
    %c0_6 = arith.constant 0 : index
    %3 = vector.load %arg3[%c0_5, %c0_6] : memref<8x1xf32, #tpu.memory_space<vmem>>, vector<8x1xf32>
    %c17_i32 = arith.constant 17 : i32
    %4 = tpu.dynamic_rotate %0 by %c17_i32 dim 1 : vector<8x512xf32>, i32 -> vector<8x512xf32>
    %5 = vector.extract_strided_slice %1 {offsets = [0, 0], sizes = [8, 1], strides = [1, 1]} : vector<8x9xf32> to vector<8x1xf32>
    %6 = vector.extract_strided_slice %2 {offsets = [0, 0], sizes = [1, 512], strides = [1, 1]} : vector<9x512xf32> to vector<1x512xf32>
    %7 = vector.broadcast %5 : vector<8x1xf32> to vector<8x512xf32>
    %8 = vector.broadcast %6 : vector<1x512xf32> to vector<8x512xf32>
    %9 = arith.mulf %7, %8 : vector<8x512xf32>
    %10 = arith.mulf %4, %9 : vector<8x512xf32>
    %11 = vector.broadcast %3 : vector<8x1xf32> to vector<8x512xf32>
    %12 = arith.addf %11, %10 : vector<8x512xf32>
    %c16_i32 = arith.constant 16 : i32
    %13 = tpu.dynamic_rotate %0 by %c16_i32 dim 1 : vector<8x512xf32>, i32 -> vector<8x512xf32>
    %14 = vector.extract_strided_slice %1 {offsets = [0, 1], sizes = [8, 1], strides = [1, 1]} : vector<8x9xf32> to vector<8x1xf32>
    %15 = vector.extract_strided_slice %2 {offsets = [1, 0], sizes = [1, 512], strides = [1, 1]} : vector<9x512xf32> to vector<1x512xf32>
    %16 = vector.broadcast %14 : vector<8x1xf32> to vector<8x512xf32>
    %17 = vector.broadcast %15 : vector<1x512xf32> to vector<8x512xf32>
    %18 = arith.mulf %16, %17 : vector<8x512xf32>
    %19 = arith.mulf %13, %18 : vector<8x512xf32>
    %20 = arith.addf %12, %19 : vector<8x512xf32>
    %c15_i32 = arith.constant 15 : i32
    %21 = tpu.dynamic_rotate %0 by %c15_i32 dim 1 : vector<8x512xf32>, i32 -> vector<8x512xf32>
    %22 = vector.extract_strided_slice %1 {offsets = [0, 2], sizes = [8, 1], strides = [1, 1]} : vector<8x9xf32> to vector<8x1xf32>
    %23 = vector.extract_strided_slice %2 {offsets = [2, 0], sizes = [1, 512], strides = [1, 1]} : vector<9x512xf32> to vector<1x512xf32>
    %24 = vector.broadcast %22 : vector<8x1xf32> to vector<8x512xf32>
    %25 = vector.broadcast %23 : vector<1x512xf32> to vector<8x512xf32>
    %26 = arith.mulf %24, %25 : vector<8x512xf32>
    %27 = arith.mulf %21, %26 : vector<8x512xf32>
    %28 = arith.addf %20, %27 : vector<8x512xf32>
    %c1_i32 = arith.constant 1 : i32
    %29 = tpu.dynamic_rotate %0 by %c1_i32 dim 1 : vector<8x512xf32>, i32 -> vector<8x512xf32>
    %30 = vector.extract_strided_slice %1 {offsets = [0, 3], sizes = [8, 1], strides = [1, 1]} : vector<8x9xf32> to vector<8x1xf32>
    %31 = vector.extract_strided_slice %2 {offsets = [3, 0], sizes = [1, 512], strides = [1, 1]} : vector<9x512xf32> to vector<1x512xf32>
    %32 = vector.broadcast %30 : vector<8x1xf32> to vector<8x512xf32>
    %33 = vector.broadcast %31 : vector<1x512xf32> to vector<8x512xf32>
    %34 = arith.mulf %32, %33 : vector<8x512xf32>
    %35 = arith.mulf %29, %34 : vector<8x512xf32>
    %36 = arith.addf %28, %35 : vector<8x512xf32>
    %37 = vector.extract_strided_slice %1 {offsets = [0, 4], sizes = [8, 1], strides = [1, 1]} : vector<8x9xf32> to vector<8x1xf32>
    %38 = vector.broadcast %37 : vector<8x1xf32> to vector<8x512xf32>
    %39 = arith.mulf %0, %38 : vector<8x512xf32>
    %40 = arith.addf %36, %39 : vector<8x512xf32>
    %c511_i32 = arith.constant 511 : i32
    %41 = tpu.dynamic_rotate %0 by %c511_i32 dim 1 : vector<8x512xf32>, i32 -> vector<8x512xf32>
    %42 = vector.extract_strided_slice %1 {offsets = [0, 5], sizes = [8, 1], strides = [1, 1]} : vector<8x9xf32> to vector<8x1xf32>
    %43 = vector.extract_strided_slice %2 {offsets = [5, 0], sizes = [1, 512], strides = [1, 1]} : vector<9x512xf32> to vector<1x512xf32>
    %44 = vector.broadcast %42 : vector<8x1xf32> to vector<8x512xf32>
    %45 = vector.broadcast %43 : vector<1x512xf32> to vector<8x512xf32>
    %46 = arith.mulf %44, %45 : vector<8x512xf32>
    %47 = arith.mulf %41, %46 : vector<8x512xf32>
    %48 = arith.addf %40, %47 : vector<8x512xf32>
    %c497_i32 = arith.constant 497 : i32
    %49 = tpu.dynamic_rotate %0 by %c497_i32 dim 1 : vector<8x512xf32>, i32 -> vector<8x512xf32>
    %50 = vector.extract_strided_slice %1 {offsets = [0, 6], sizes = [8, 1], strides = [1, 1]} : vector<8x9xf32> to vector<8x1xf32>
    %51 = vector.extract_strided_slice %2 {offsets = [6, 0], sizes = [1, 512], strides = [1, 1]} : vector<9x512xf32> to vector<1x512xf32>
    %52 = vector.broadcast %50 : vector<8x1xf32> to vector<8x512xf32>
    %53 = vector.broadcast %51 : vector<1x512xf32> to vector<8x512xf32>
    %54 = arith.mulf %52, %53 : vector<8x512xf32>
    %55 = arith.mulf %49, %54 : vector<8x512xf32>
    %56 = arith.addf %48, %55 : vector<8x512xf32>
    %c496_i32 = arith.constant 496 : i32
    %57 = tpu.dynamic_rotate %0 by %c496_i32 dim 1 : vector<8x512xf32>, i32 -> vector<8x512xf32>
    %58 = vector.extract_strided_slice %1 {offsets = [0, 7], sizes = [8, 1], strides = [1, 1]} : vector<8x9xf32> to vector<8x1xf32>
    %59 = vector.extract_strided_slice %2 {offsets = [7, 0], sizes = [1, 512], strides = [1, 1]} : vector<9x512xf32> to vector<1x512xf32>
    %60 = vector.broadcast %58 : vector<8x1xf32> to vector<8x512xf32>
    %61 = vector.broadcast %59 : vector<1x512xf32> to vector<8x512xf32>
    %62 = arith.mulf %60, %61 : vector<8x512xf32>
    %63 = arith.mulf %57, %62 : vector<8x512xf32>
    %64 = arith.addf %56, %63 : vector<8x512xf32>
    %c495_i32 = arith.constant 495 : i32
    %65 = tpu.dynamic_rotate %0 by %c495_i32 dim 1 : vector<8x512xf32>, i32 -> vector<8x512xf32>
    %66 = vector.extract_strided_slice %1 {offsets = [0, 8], sizes = [8, 1], strides = [1, 1]} : vector<8x9xf32> to vector<8x1xf32>
    %67 = vector.extract_strided_slice %2 {offsets = [8, 0], sizes = [1, 512], strides = [1, 1]} : vector<9x512xf32> to vector<1x512xf32>
    %68 = vector.broadcast %66 : vector<8x1xf32> to vector<8x512xf32>
    %69 = vector.broadcast %67 : vector<1x512xf32> to vector<8x512xf32>
    %70 = arith.mulf %68, %69 : vector<8x512xf32>
    %71 = arith.mulf %65, %70 : vector<8x512xf32>
    %72 = arith.addf %64, %71 : vector<8x512xf32>
    %cst = arith.constant 0.000000e+00 : f32
    %73 = vector.broadcast %cst : f32 to vector<8x512xf32>
    %74 = arith.cmpf ogt, %72, %73 : vector<8x512xf32>
    %cst_7 = arith.constant 1.000000e-01 : f32
    %75 = vector.broadcast %cst_7 : f32 to vector<8x512xf32>
    %76 = arith.mulf %75, %72 : vector<8x512xf32>
    %77 = arith.select %74, %72, %76 : vector<8x512xi1>, vector<8x512xf32>
    %c0_8 = arith.constant 0 : index
    %c0_9 = arith.constant 0 : index
    %78 = vector.load %arg5[%c0_8, %c0_9] : memref<16x8xf32, #tpu.memory_space<vmem>>, vector<16x8xf32>
    %cst_10 = arith.constant dense<0.000000e+00> : vector<16x512xf32>
    %79 = tpu.matmul %78, %77, %cst_10 {dimension_numbers = #tpu.dot_dimension_numbers<[1], [0], [0], [1], [0, 0, 1, 1], [], []>} : vector<16x8xf32>, vector<8x512xf32>, vector<16x512xf32> -> vector<16x512xf32>
    %c0_11 = arith.constant 0 : index
    %c0_12 = arith.constant 0 : index
    %80 = vector.load %arg6[%c0_11, %c0_12] : memref<16x1xf32, #tpu.memory_space<vmem>>, vector<16x1xf32>
    %81 = vector.broadcast %80 : vector<16x1xf32> to vector<16x512xf32>
    %82 = arith.addf %79, %81 : vector<16x512xf32>
    %cst_13 = arith.constant 0.000000e+00 : f32
    %83 = vector.broadcast %cst_13 : f32 to vector<16x512xf32>
    %84 = arith.cmpf ogt, %82, %83 : vector<16x512xf32>
    %cst_14 = arith.constant 1.000000e-01 : f32
    %85 = vector.broadcast %cst_14 : f32 to vector<16x512xf32>
    %86 = arith.mulf %85, %82 : vector<16x512xf32>
    %87 = arith.select %84, %82, %86 : vector<16x512xi1>, vector<16x512xf32>
    %c0_15 = arith.constant 0 : index
    %c0_16 = arith.constant 0 : index
    %88 = vector.load %arg7[%c0_15, %c0_16] : memref<16x512xf32, #tpu.memory_space<vmem>>, vector<16x512xf32>
    tpu.vector_store %arg7[%c0_15, %c0_16], %87 {strides = array<i32>} : memref<16x512xf32, #tpu.memory_space<vmem>>, vector<16x512xf32>,
    return
  }
  func.func @transform_0(%arg0: i32) -> (i32, i32) {
    %c0_i32 = arith.constant 0 : i32
    %c0_i32_0 = arith.constant 0 : i32
    return %c0_i32, %arg0 : i32, i32
  }
  func.func @transform_1(%arg0: i32) -> (i32, i32) {
    %c0_i32 = arith.constant 0 : i32
    %c0_i32_0 = arith.constant 0 : i32
    %c0_i32_1 = arith.constant 0 : i32
    return %c0_i32, %c0_i32_0 : i32, i32
  }
  func.func @transform_2(%arg0: i32) -> (i32, i32) {
    %c0_i32 = arith.constant 0 : i32
    %c0_i32_0 = arith.constant 0 : i32
    %c0_i32_1 = arith.constant 0 : i32
    return %c0_i32, %c0_i32_0 : i32, i32
  }
  func.func @transform_3(%arg0: i32) -> (i32, i32) {
    %c0_i32 = arith.constant 0 : i32
    %c0_i32_0 = arith.constant 0 : i32
    %c0_i32_1 = arith.constant 0 : i32
    return %c0_i32, %c0_i32_0 : i32, i32
  }
  func.func @transform_4(%arg0: i32) -> (i32, i32) {
    %c0_i32 = arith.constant 0 : i32
    %c0_i32_0 = arith.constant 0 : i32
    %c0_i32_1 = arith.constant 0 : i32
    return %c0_i32, %c0_i32_0 : i32, i32
  }
  func.func @transform_5(%arg0: i32) -> (i32, i32) {
    %c0_i32 = arith.constant 0 : i32
    %c0_i32_0 = arith.constant 0 : i32
    %c0_i32_1 = arith.constant 0 : i32
    return %c0_i32, %c0_i32_0 : i32, i32
  }
  func.func @transform_6(%arg0: i32) -> (i32, i32) {
    %c0_i32 = arith.constant 0 : i32
    %c0_i32_0 = arith.constant 0 : i32
    return %c0_i32, %arg0 : i32, i32
  }
}

</mosaic_0001>

<bundles_post_ra>
// kernel: tpu_custom_call.1
= control target key start
LH: loop header
LB: loop body
LE: loop exit
PB: predicated region body
PF: predicated region fallthrough
CT: control target
= control target key end

     0   :  { %11 = vsyncpa [#allocation3], 0  ;;  %s1184_s0 = inlined_call_operand.vmem [shape: f32[8,512], index: 0, kind: input, shape index: {}]   ;;  %s1185_s1 = inlined_call_operand.vmem [shape: f32[8,9], index: 1, kind: input, shape index: {}]   ;;  %s1186_s2 = inlined_call_operand.vmem [shape: f32[8,1], index: 2, kind: input, shape index: {}]   ;;  %s1187_s3 = inlined_call_operand.hbm [shape: f32[9,512], index: 3, kind: input, shape index: {}]   ;;  %s1188_s4 = inlined_call_operand.vmem [shape: f32[16,8], index: 4, kind: input, shape index: {}]   ;;  %s1189_s5 = inlined_call_operand.vmem [shape: f32[16,1], index: 5, kind: input, shape index: {}]   ;;  %s1190_s6 = inlined_call_operand.hbm [shape: f32[16,512], index: 6, kind: output, shape index: {}]  }
   0x1   :  { %12 = vsyncpa [#allocation4], 0  ;;  %s757_s21 = smov [#allocation2]   ;;  %s709_s25 = scalar_lea.hbm %s1187_s3, 1024 }
   0x2   :  { %s24_s22 = sshll.u32 %s757_s21, 4  ;;  %p710_p0 = scmp.ne.s32.totalorder %s1187_s3, %s709_s25  ;;  %s25_s22 = int_to_ptr.vmem [resolvable:$true] %s24_s22 }
   0x3   :  { %p713_p1 = scmp.lt.u32.totalorder %s709_s25, %s1187_s3 }
   0x5   :  { %p715_p2 = pnand %p713_p1, %p710_p0 }
   0x7   :  { %718 = shalt.err (!%p715_p2)
}
   0x8   :  { %s719_s30 = scalar_lea.vmem %s25_s22, 1024  ;;  %p724_p4 = scmp.lt.s32.totalorder %s25_s22, %s25_s22 }
   0x9   :  { %p720_p3 = scmp.ne.s32.totalorder %s25_s22, %s719_s30  ;;  %p725_p5 = scmp.lt.s32.totalorder %s719_s30, %s719_s30 }
   0xb   :  { %p726_p6 = por %p725_p5, %p724_p4 }
   0xd   :  { %p727_p7 = pnand %p726_p6, %p720_p3 }
   0xf   :  { %730 = shalt.err (!%p727_p7)
}
  0x10   :  { %s758_s7 = smov 512   ;;  %s759_s8 = smov 32  }
  0x11   :  { %30 = dma.hbm_to_vmem [thread:$0]  %s1187_s3, 1024, %s25_s22, [#allocation3], %s758_s7, %s758_s7, %s759_s8  }
  0x12   :  { %753 = dma.done.wait [#allocation3], 1024  }
  0x13   :  { %754 = vsyncadd [#allocation3], 4294966272  ;;  %v760_v0 = vmov 1   ;;  %v761_v1 = vmov 0   ;;  %v51_v2 = vld [vmem:[%s1186_s2] sm:$0xff]  ;;  %v762_v5 = vmov 2   ;;  %v60_v31 = vlaneseq }
  0x14   :  { %698 = vset.pattern.permute.xlu0 %v760_v0  ;;  %699 = vset.pattern.permute.xlu1 %v761_v1  ;;  %v42_v3 = vld [vmem:[%s1185_s1] sm:$0xff]  ;;  %s763_s3 = smov 17   ;;  %v844_v6 = vld [vmem:[%s1184_s0 + $0x10] sm:$0xff]  ;;  %v764_v7 = vmov 4   ;;  %v765_v8 = vmov 3   ;;  %v850_v9 = vld [vmem:[%s1184_s0 + $0x8] sm:$0xff] }
  0x15   :  { %98 = vperm.xlu1 %699, %v51_v2   ;;  %119 = vperm.xlu0 %698, %v42_v3   ;;  %v838_v4 = vld [vmem:[%s1184_s0] sm:$0xff]  ;;  %s766_s19 = smov 16   ;;  %v857_v10 = vld [vmem:[%s1184_s0 + $0x18] sm:$0xff]  ;;  %v767_v11 = vmov 5   ;;  %s768_s22 = smov 15   ;;  %v769_v12 = vmov 7  }
  0x16   :  { %s770_s0 = smov 1   ;;  %v771_v13 = vmov 6   ;;  %v772_v14 = vmov 8   ;;  %s773_s23 = smov 127   ;;  %v447_v15 = vld [vmem:[%s1189_s5 + $0x8] sm:$0xff]  ;;  %v1191_v16 = vmov 0.0  }
  0x17   :  { %s774_s24 = smov 113   ;;  %s775_s25 = smov 112   ;;  %606 = vmatprep.mubr.f32.mxu1 %v1191_v16  ;;  %529 = vmatprep.mubr.f32.mxu0 %v1191_v16  ;;  %v446_v17 = vld [vmem:[%s1189_s5] sm:$0xff]  ;;  %v917_v34 = vshrl.u32 %v60_v31, 7  ;;  %v931_v41 = vld [vmem:[#allocation2 + $0x8] sm:$0xff]  ;;  %v938_v44 = vand.u32 127, %v60_v31 }
  0x18   :  { %s776_s26 = smov 111   ;;  %v929_v40 = vld [vmem:[#allocation2] sm:$0xff]  ;;  %v940_v45 = vld [vmem:[#allocation2 + $0x10] sm:$0xff]  ;;  %v969_v58 = vld [vmem:[#allocation2 + $0x18] sm:$0xff]  ;;  %vm458_vm12 = vcmask 64512  }
  0x19   :  { %700 = vset.pattern.permute.xlu1 %v762_v5  ;;  %52 = vrot.lane.b32.xlu0 %v838_v4, %s763_s3  ;;  %v924_v37 = vsub.s32 2, %v917_v34  ;;  %v927_v39 = vsub.s32 1, %v917_v34  ;;  %v936_v43 = vsub.s32 3, %v917_v34  ;;  %v943_v46 = vsub.s32 0, %v917_v34 }
  0x1a   :  { %164 = vperm.xlu1 %700, %v42_v3   ;;  %702 = vset.pattern.permute.xlu0 %v764_v7  ;;  %vm62_vm0 = vcmp.lt.s32.totalorder %v938_v44, 17  ;;  %vm113_vm1 = vcmp.lt.s32.totalorder %v938_v44, 16  ;;  %vm158_vm2 = vcmp.lt.s32.totalorder %v938_v44, 15  ;;  %vm203_vm3 = vcmp.lt.s32.totalorder %v938_v44, 1 }
  0x1b   :  { %v170_v47 = vrot.slane %v929_v40, %v924_v37  ;;  %v129_v49 = vrot.slane %v931_v41, %v927_v39  ;;  %v133_v50 = vrot.slane %v940_v45, %v927_v39  ;;  %v125_v51 = vrot.slane %v929_v40, %v927_v39 }
  0x1c   :  { %v174_v52 = vrot.slane %v931_v41, %v924_v37  ;;  %v178_v53 = vrot.slane %v940_v45, %v924_v37  ;;  %v219_v55 = vrot.slane %v931_v41, %v936_v43  ;;  %v223_v56 = vrot.slane %v940_v45, %v936_v43 }
  0x1d   :  { %56 = vrot.lane.b32.xlu0 %v844_v6, %s763_s3  ;;  %v215_v57 = vrot.slane %v929_v40, %v936_v43  ;;  %v75_v59 = vrot.slane %v929_v40, %v943_v46  ;;  %v79_v61 = vrot.slane %v931_v41, %v943_v46  ;;  %v83_v62 = vrot.slane %v940_v45, %v943_v46 }
  0x1e   :  { %701 = vset.pattern.permute.xlu1 %v765_v8  ;;  %v87_v63 = vrot.slane %v969_v58, %v943_v46  ;;  %vm260_vm4 = vcmp.lt.s32.totalorder %v938_v44, 127  ;;  %vm305_vm5 = vcmp.lt.s32.totalorder %v938_v44, 113  ;;  %vm350_vm6 = vcmp.lt.s32.totalorder %v938_v44, 112 }
  0x1f   :  { %209 = vperm.xlu1 %701, %v42_v3   ;;  %vm395_vm7 = vcmp.lt.s32.totalorder %v938_v44, 111 }
  0x21   :  { %105 = vrot.lane.b32.xlu0 %v838_v4, %s766_s19 }
  0x23   :  { %54 = vrot.lane.b32.xlu1 %v850_v9, %s763_s3 }
  0x24   :  { %703 = vset.pattern.permute.xlu1 %v767_v11 }
  0x25   :  { %109 = vrot.lane.b32.xlu0 %v844_v6, %s766_s19 }
  0x27   :  { %58 = vrot.lane.b32.xlu1 %v857_v10, %s763_s3 }
  0x29   :  { %241 = vperm.xlu0 %702, %v42_v3  }
  0x2b   :  { %107 = vrot.lane.b32.xlu1 %v850_v9, %s766_s19 }
  0x2d   :  { %152 = vrot.lane.b32.xlu0 %v850_v9, %s768_s22 }
  0x2e   :  { %705 = vset.pattern.permute.xlu0 %v769_v12 }
  0x2f   :  { %111 = vrot.lane.b32.xlu1 %v857_v10, %s766_s19 }
  0x31   :  { %156 = vrot.lane.b32.xlu0 %v857_v10, %s768_s22 }
  0x33   :  { %266 = vperm.xlu1 %703, %v42_v3  }
  0x35   :  { %195 = vrot.lane.b32.xlu0 %v838_v4, %s770_s0 }
  0x37   :  { %150 = vrot.lane.b32.xlu1 %v838_v4, %s768_s22 }
  0x38   :  { %704 = vset.pattern.permute.xlu1 %v771_v13 }
  0x39   :  { %199 = vrot.lane.b32.xlu0 %v844_v6, %s770_s0 }
  0x3b   :  { %154 = vrot.lane.b32.xlu1 %v844_v6, %s768_s22 }
  0x3d   :  { %356 = vperm.xlu0 %705, %v42_v3  }
  0x3f   :  { %311 = vperm.xlu1 %704, %v42_v3  }
  0x41   :  { %706 = vset.pattern.permute.xlu0 %v761_v1 }
  0x42   :  { %69 = vperm.xlu0 %706, %v42_v3  }
  0x43   :  { %197 = vrot.lane.b32.xlu1 %v850_v9, %s770_s0 }
  0x44   :  { %707 = vset.pattern.permute.xlu1 %v772_v14 }
  0x46   :  { %254 = vrot.lane.b32.xlu0 %v850_v9, %s773_s23 }
  0x47   :  { %201 = vrot.lane.b32.xlu1 %v857_v10, %s770_s0 }
  0x4a   :  { %258 = vrot.lane.b32.xlu0 %v857_v10, %s773_s23 }
  0x4b   :  { %401 = vperm.xlu1 %707, %v42_v3  }
  0x4e   :  { %299 = vrot.lane.b32.xlu0 %v850_v9, %s774_s24 }
  0x4f   :  { %252 = vrot.lane.b32.xlu1 %v838_v4, %s773_s23 }
  0x50   :  { %708 = vset.pattern.permute.xlu1 %v761_v1 }
  0x52   :  { %303 = vrot.lane.b32.xlu0 %v857_v10, %s774_s24 }
  0x53   :  { %256 = vrot.lane.b32.xlu1 %v844_v6, %s773_s23 }
  0x56   :  { %344 = vrot.lane.b32.xlu0 %v850_v9, %s775_s25 }
  0x57   :  { %297 = vrot.lane.b32.xlu1 %v838_v4, %s774_s24 }
  0x5a   :  { %348 = vrot.lane.b32.xlu0 %v857_v10, %s775_s25 }
  0x5b   :  { %301 = vrot.lane.b32.xlu1 %v844_v6, %s774_s24 }
  0x5e   :  { %389 = vrot.lane.b32.xlu0 %v850_v9, %s776_s26 }
  0x5f   :  { %342 = vrot.lane.b32.xlu1 %v838_v4, %s775_s25 }
  0x62   :  { %393 = vrot.lane.b32.xlu0 %v857_v10, %s776_s26 }
  0x63   :  { %346 = vrot.lane.b32.xlu1 %v844_v6, %s775_s25 }
  0x66   :  { %455 = vperm.xlu0 %706, %v447_v15  }
  0x67   :  { %387 = vrot.lane.b32.xlu1 %v838_v4, %s776_s26 }
  0x6b   :  { %391 = vrot.lane.b32.xlu1 %v844_v6, %s776_s26 }
  0x6f   :  { %450 = vperm.xlu1 %708, %v446_v17  }
  0x94   :  { %v895_v18 = vpop.permute.xlu1 %98  ;;  %v897_v19 = vpop.permute.xlu0 %119 }
  0x95   :  { %v139_v0 = vmul.f32 %v129_v49, %v897_v19  ;;  %v140_v1 = vmul.f32 %v133_v50, %v897_v19  ;;  %v138_v2 = vmul.f32 %v125_v51, %v897_v19 }
  0x98   :  { %v899_v20 = vpop.permute.xlu0 %52 }
  0x99   :  { %v901_v21 = vpop.permute.xlu1 %164 }
  0x9a   :  { %v183_v3 = vmul.f32 %v170_v47, %v901_v21  ;;  %v184_v5 = vmul.f32 %v174_v52, %v901_v21  ;;  %v185_v7 = vmul.f32 %v178_v53, %v901_v21 }
  0x9c   :  { %v903_v22 = vpop.permute.xlu0 %56 }
  0x9e   :  { %v905_v23 = vpop.permute.xlu1 %209 }
  0x9f   :  { %v229_v8 = vmul.f32 %v219_v55, %v905_v23  ;;  %v230_v11 = vmul.f32 %v223_v56, %v905_v23  ;;  %v228_v17 = vmul.f32 %v215_v57, %v905_v23 }
  0xa0   :  { %v106_v24 = vpop.permute.xlu0 %105 }
  0xa2   :  { %v55_v25 = vpop.permute.xlu1 %54 }
  0xa3   :  { %v64_v12 = vsel %vm62_vm0, %v55_v25, %v903_v22  ;;  %v65_v51 = vsel %vm62_vm0, %v899_v20, %v55_v25 }
  0xa4   :  { %v907_v26 = vpop.permute.xlu0 %109 }
  0xa6   :  { %v909_v27 = vpop.permute.xlu1 %58 }
  0xa8   :  { %v911_v28 = vpop.permute.xlu0 %241 }
  0xaa   :  { %v108_v29 = vpop.permute.xlu1 %107 }
  0xab   :  { %v115_v13 = vsel %vm113_vm1, %v108_v29, %v907_v26  ;;  %v116_v14 = vsel %vm113_vm1, %v106_v24, %v108_v29  ;;  %v66_v29 = vsel %vm62_vm0, %v909_v27, %v899_v20 }
  0xac   :  { %v153_v30 = vpop.permute.xlu0 %152  ;;  %v143_v25 = vmul.f32 %v139_v0, %v116_v14 }
  0xae   :  { %v913_v32 = vpop.permute.xlu1 %111 }
  0xaf   :  { %v117_v31 = vsel %vm113_vm1, %v913_v32, %v106_v24 }
  0xb0   :  { %v915_v33 = vpop.permute.xlu0 %156 }
  0xb2   :  { %v919_v35 = vpop.permute.xlu1 %266 }
  0xb4   :  { %v921_v36 = vpop.permute.xlu0 %195 }
  0xb6   :  { %v151_v38 = vpop.permute.xlu1 %150 }
  0xb7   :  { %v161_v52 = vsel %vm158_vm2, %v151_v38, %v153_v30  ;;  %v162_v24 = vsel %vm158_vm2, %v915_v33, %v151_v38 }
  0xb8   :  { %v933_v42 = vpop.permute.xlu0 %199  ;;  %v187_v0 = vmul.f32 %v183_v3, %v162_v24  ;;  %v63_v3 = vsel %vm62_vm0, %v903_v22, %v909_v27  ;;  %v182_v27 = vrot.slane %v969_v58, %v924_v37 }
  0xba   :  { %v947_v48 = vpop.permute.xlu1 %154 }
  0xbb   :  { %v160_v53 = vsel %vm158_vm2, %v153_v30, %v947_v48 }
  0xbc   :  { %v959_v54 = vpop.permute.xlu0 %356 }
  0xbe   :  { %v974_v60 = vpop.permute.xlu1 %311 }
  0xbf   :  { %1195 = vst [vmem:[#allocation8_spill] sm:$0xff] %v974_v60 }
  0xc1   :  { %v70_v15 = vpop.permute.xlu0 %69 }
  0xc2   :  { %v88_v46 = vmul.f32 %v75_v59, %v70_v15  ;;  %v89_v47 = vmul.f32 %v79_v61, %v70_v15  ;;  %v90_v49 = vmul.f32 %v83_v62, %v70_v15  ;;  %v198_v50 = vpop.permute.xlu1 %197  ;;  %v144_v59 = vmul.f32 %v140_v1, %v115_v13 }
  0xc3   :  { %v142_v61 = vmul.f32 %v138_v2, %v117_v31  ;;  %v205_v20 = vsel %vm203_vm3, %v198_v50, %v933_v42  ;;  %v206_v30 = vsel %vm203_vm3, %v921_v36, %v198_v50  ;;  %v188_v1 = vmul.f32 %v184_v5, %v161_v52 }
  0xc4   :  { %v92_v55 = vmul.f32 %v88_v46, %v66_v29  ;;  %v93_v56 = vmul.f32 %v89_v47, %v65_v51  ;;  %v94_v57 = vmul.f32 %v90_v49, %v64_v12  ;;  %v189_v2 = vmul.f32 %v185_v7, %v160_v53 }
  0xc5   :  { %v1021_v62 = vpop.permute.xlu0 %254  ;;  %v91_v14 = vmul.f32 %v87_v63, %v70_v15  ;;  %v233_v49 = vmul.f32 %v229_v8, %v206_v30  ;;  %v234_v51 = vmul.f32 %v230_v11, %v205_v20  ;;  %v114_v11 = vsel %vm113_vm1, %v907_v26, %v913_v32 }
  0xc6   :  { %1196 = vst [vmem:[#allocation9_spill] sm:$0xff] %v1021_v62  ;;  %v101_v16 = vadd.f32 %v895_v18, %v92_v55  ;;  %v102_v38 = vadd.f32 %v895_v18, %v93_v56  ;;  %v103_v60 = vadd.f32 %v895_v18, %v94_v57  ;;  %v202_v12 = vpop.permute.xlu1 %201  ;;  %v271_v15 = vsub.s32 5, %v917_v34 }
  0xc7   :  { %v207_v13 = vsel %vm203_vm3, %v202_v12, %v921_v36  ;;  %v137_v36 = vrot.slane %v969_v58, %v927_v39  ;;  %v316_v53 = vsub.s32 6, %v917_v34  ;;  %v159_v26 = vsel %vm158_vm2, %v947_v48, %v915_v33 }
  0xc8   :  { %v147_v31 = vadd.f32 %v143_v25, %v102_v38  ;;  %v148_v46 = vadd.f32 %v144_v59, %v103_v60  ;;  %v146_v47 = vadd.f32 %v142_v61, %v101_v16  ;;  %v232_v50 = vmul.f32 %v228_v17, %v207_v13 }
  0xc9   :  { %v1032_v29 = vpop.permute.xlu0 %258  ;;  %v95_v60 = vmul.f32 %v91_v14, %v63_v3  ;;  %v141_v22 = vmul.f32 %v137_v36, %v897_v19  ;;  %v361_v19 = vsub.s32 7, %v917_v34  ;;  %v186_v32 = vmul.f32 %v182_v27, %v901_v21 }
  0xca   :  { %v192_v55 = vadd.f32 %v188_v1, %v147_v31  ;;  %v193_v56 = vadd.f32 %v189_v2, %v148_v46  ;;  %v191_v57 = vadd.f32 %v187_v0, %v146_v47  ;;  %v1034_v62 = vpop.permute.xlu1 %401  ;;  %v272_v25 = vrot.slane %v929_v40, %v271_v15 }
  0xcb   :  { %v104_v39 = vadd.f32 %v895_v18, %v95_v60  ;;  %v145_v52 = vmul.f32 %v141_v22, %v114_v11  ;;  %v227_v18 = vrot.slane %v969_v58, %v936_v43  ;;  %v284_v59 = vrot.slane %v969_v58, %v271_v15 }
  0xcc   :  { %v1042_v16 = vadd.f32 %v233_v49, %v192_v55  ;;  %v1044_v63 = vadd.f32 %v234_v51, %v193_v56  ;;  %v1046_v5 = vadd.f32 %v232_v50, %v191_v57  ;;  %v276_v61 = vrot.slane %v931_v41, %v271_v15 }
  0xcd   :  { %v1048_v7 = vpop.permute.xlu0 %299  ;;  %v149_v37 = vadd.f32 %v145_v52, %v104_v39  ;;  %v190_v38 = vmul.f32 %v186_v32, %v159_v26  ;;  %v280_v30 = vrot.slane %v940_v45, %v271_v15  ;;  %v317_v33 = vrot.slane %v929_v40, %v316_v53  ;;  %v1198_v36 = vld [vmem:[#allocation9_spill] sm:$0xff] }
  0xce   :  { %v253_v8 = vpop.permute.xlu1 %252  ;;  %v329_v34 = vrot.slane %v969_v58, %v316_v53  ;;  %v204_v43 = vsel %vm203_vm3, %v933_v42, %v202_v12  ;;  %v321_v48 = vrot.slane %v931_v41, %v316_v53  ;;  %v325_v0 = vrot.slane %v940_v45, %v316_v53 }
  0xcf   :  { %v362_v1 = vrot.slane %v929_v40, %v361_v19  ;;  %v231_v2 = vmul.f32 %v227_v18, %v905_v23  ;;  %v194_v13 = vadd.f32 %v190_v38, %v149_v37  ;;  %v374_v14 = vrot.slane %v969_v58, %v361_v19 }
  0xd0   :  { %v366_v31 = vrot.slane %v931_v41, %v361_v19  ;;  %v370_v42 = vrot.slane %v940_v45, %v361_v19  ;;  %v244_v12 = vmul.f32 %v911_v28, %v838_v4  ;;  %v245_v40 = vmul.f32 %v911_v28, %v850_v9 }
  0xd1   :  { %v1059_v17 = vpop.permute.xlu0 %303  ;;  %v246_v23 = vmul.f32 %v911_v28, %v844_v6  ;;  %v235_v58 = vmul.f32 %v231_v2, %v204_v43  ;;  %v247_v47 = vmul.f32 %v911_v28, %v857_v10  ;;  %v285_v49 = vmul.f32 %v272_v25, %v919_v35  ;;  %v668_v6 = vld [vmem:[#allocation2 + $0x20] ss:$0 sm:$0xff] }
  0xd2   :  { %v257_v24 = vpop.permute.xlu1 %256  ;;  %v288_v51 = vmul.f32 %v284_v59, %v919_v35  ;;  %v286_v45 = vmul.f32 %v276_v61, %v919_v35  ;;  %v287_v4 = vmul.f32 %v280_v30, %v919_v35  ;;  %v375_v9 = vmul.f32 %v362_v1, %v959_v54  ;;  %v1197_v28 = vld [vmem:[#allocation8_spill] sm:$0xff]  ;;  %v671_v30 = vld [vmem:[#allocation2 + $0x38] ss:$0 sm:$0xff] }
  0xd3   :  { %v239_v55 = vadd.f32 %v235_v58, %v194_v13  ;;  %v378_v56 = vmul.f32 %v374_v14, %v959_v54  ;;  %v264_v10 = vsel %vm260_vm4, %v1032_v29, %v253_v8  ;;  %v330_v57 = vmul.f32 %v317_v33, %v1197_v28 }
  0xd4   :  { %v376_v50 = vmul.f32 %v366_v31, %v959_v54  ;;  %v377_v3 = vmul.f32 %v370_v42, %v959_v54  ;;  %v263_v35 = vsel %vm260_vm4, %v253_v8, %v1198_v36  ;;  %v262_v60 = vsel %vm260_vm4, %v1198_v36, %v257_v24 }
  0xd5   :  { %v1073_v20 = vpop.permute.xlu0 %344  ;;  %v333_v11 = vmul.f32 %v329_v34, %v1197_v28  ;;  %v331_v22 = vmul.f32 %v321_v48, %v1197_v28  ;;  %v261_v39 = vsel %vm260_vm4, %v257_v24, %v1032_v29  ;;  %v332_v15 = vmul.f32 %v325_v0, %v1197_v28 }
  0xd6   :  { %v298_v21 = vpop.permute.xlu1 %297  ;;  %v420_v8 = vmul.f32 %v668_v6, %v1034_v62  ;;  %v248_v52 = vadd.f32 %v244_v12, %v1046_v5  ;;  %v251_v53 = vadd.f32 %v247_v47, %v239_v55  ;;  %v292_v26 = vmul.f32 %v288_v51, %v264_v10  ;;  %v670_v47 = vld [vmem:[#allocation2 + $0x30] ss:$0 sm:$0xff] }
  0xd7   :  { %v309_v54 = vsel %vm305_vm5, %v1059_v17, %v298_v21  ;;  %v308_v19 = vsel %vm305_vm5, %v298_v21, %v1048_v7  ;;  %v289_v18 = vmul.f32 %v285_v49, %v263_v35  ;;  %v290_v37 = vmul.f32 %v286_v45, %v262_v60 }
  0xd8   :  { %v291_v25 = vmul.f32 %v287_v4, %v261_v39  ;;  %v337_v59 = vmul.f32 %v333_v11, %v309_v54  ;;  %v249_v33 = vadd.f32 %v245_v40, %v1042_v16  ;;  %v250_v34 = vadd.f32 %v246_v23, %v1044_v63 }
  0xd9   :  { %v349_v46 = vpop.permute.xlu0 %348  ;;  %v296_v43 = vadd.f32 %v292_v26, %v251_v53  ;;  %v293_v1 = vadd.f32 %v289_v18, %v248_v52  ;;  %v423_v14 = vmul.f32 %v671_v30, %v1034_v62  ;;  %v422_v10 = vmul.f32 %v670_v47, %v1034_v62  ;;  %v444_v52 = vld [vmem:[%s1188_s4] sm:$0xff] }
  0xda   :  { %v302_v41 = vpop.permute.xlu1 %301  ;;  %v294_v31 = vadd.f32 %v290_v37, %v249_v33  ;;  %v295_v16 = vadd.f32 %v291_v25, %v250_v34 }
  0xdb   :  { %v307_v29 = vsel %vm305_vm5, %v1048_v7, %v302_v41  ;;  %v306_v5 = vsel %vm305_vm5, %v302_v41, %v1059_v17  ;;  %v334_v7 = vmul.f32 %v330_v57, %v308_v19  ;;  %v341_v42 = vadd.f32 %v337_v59, %v296_v43 }
  0xdc   :  { %v335_v48 = vmul.f32 %v331_v22, %v307_v29  ;;  %v336_v2 = vmul.f32 %v332_v15, %v306_v5  ;;  %v1199_v19 = vmov 0.0  }
  0xdd   :  { %v390_v32 = vpop.permute.xlu0 %389  ;;  %v338_v23 = vadd.f32 %v334_v7, %v293_v1 }
  0xde   :  { %v343_v27 = vpop.permute.xlu1 %342  ;;  %v339_v49 = vadd.f32 %v335_v48, %v294_v31  ;;  %v340_v4 = vadd.f32 %v336_v2, %v295_v16 }
  0xdf   :  { %v354_v24 = vsel %vm350_vm6, %v349_v46, %v343_v27  ;;  %v353_v61 = vsel %vm350_vm6, %v343_v27, %v1073_v20 }
  0xe0   :  { %v382_v0 = vmul.f32 %v378_v56, %v354_v24  ;;  %v379_v13 = vmul.f32 %v375_v9, %v353_v61 }
  0xe1   :  { %v394_v63 = vpop.permute.xlu0 %393 }
  0xe2   :  { %v347_v38 = vpop.permute.xlu1 %346  ;;  %v386_v51 = vadd.f32 %v382_v0, %v341_v42  ;;  %v383_v9 = vadd.f32 %v379_v13, %v338_v23 }
  0xe3   :  { %v352_v21 = vsel %vm350_vm6, %v1073_v20, %v347_v38  ;;  %v351_v17 = vsel %vm350_vm6, %v347_v38, %v349_v46  ;;  %v669_v46 = vld [vmem:[#allocation2 + $0x28] ss:$0 sm:$0xff] }
  0xe4   :  { %v380_v12 = vmul.f32 %v376_v50, %v352_v21  ;;  %v381_v58 = vmul.f32 %v377_v3, %v351_v17  ;;  %v421_v6 = vmul.f32 %v669_v46, %v1034_v62 }
  0xe5   :  { %v456_v33 = vpop.permute.xlu0 %455 }
  0xe6   :  { %v388_v40 = vpop.permute.xlu1 %387  ;;  %v384_v56 = vadd.f32 %v380_v12, %v339_v49  ;;  %v385_v50 = vadd.f32 %v381_v58, %v340_v4 }
  0xe7   :  { %v398_v20 = vsel %vm395_vm7, %v388_v40, %v390_v32  ;;  %v399_v41 = vsel %vm395_vm7, %v394_v63, %v388_v40 }
  0xe8   :  { %v424_v45 = vmul.f32 %v420_v8, %v398_v20  ;;  %v427_v55 = vmul.f32 %v423_v14, %v399_v41 }
  0xea   :  { %v392_v28 = vpop.permute.xlu1 %391  ;;  %v431_v57 = vadd.f32 %v427_v55, %v386_v51  ;;  %v428_v3 = vadd.f32 %v424_v45, %v383_v9 }
  0xeb   :  { %v396_v36 = vsel %vm395_vm7, %v392_v28, %v394_v63  ;;  %v397_v35 = vsel %vm395_vm7, %v390_v32, %v392_v28  ;;  %v445_v32 = vld [vmem:[%s1188_s4 + $0x8] sm:$0xff]  ;;  %s778_s4 = smov [#allocation5]  }
  0xec   :  { %v425_v60 = vmul.f32 %v421_v6, %v397_v35  ;;  %v426_v11 = vmul.f32 %v422_v10, %v396_v36  ;;  %vm435_vm8 = vcmp.gt.f32.partialorder %v431_v57, 0.0  ;;  %v439_v22 = vmul.f32 0.1, %v431_v57  ;;  %s656_s12 = sshll.u32 %s778_s4, 4  ;;  %s657_s12 = int_to_ptr.vmem [resolvable:$true] %s656_s12 }
  0xed   :  { %vm432_vm9 = vcmp.gt.f32.partialorder %v428_v3, 0.0  ;;  %v436_v62 = vmul.f32 0.1, %v428_v3  ;;  %s731_s13 = scalar_lea.vmem %s657_s12, 1024  ;;  %p736_p9 = scmp.lt.s32.totalorder %s657_s12, %s657_s12 }
  0xee   :  { %v430_v27 = vadd.f32 %v426_v11, %v385_v50  ;;  %v443_v39 = vsel %vm435_vm8, %v431_v57, %v439_v22  ;;  %v429_v54 = vadd.f32 %v425_v60, %v384_v56  ;;  %v451_v18 = vpop.permute.xlu1 %450  ;;  %p732_p8 = scmp.ne.s32.totalorder %s657_s12, %s731_s13  ;;  %p737_p10 = scmp.lt.s32.totalorder %s731_s13, %s731_s13 }
  0xef   :  { %542 = vmatprep.subr.mxu1 %v443_v39  ;;  %v440_v26 = vsel %vm432_vm9, %v428_v3, %v436_v62 }
  0xf0   :  { %vm433_vm10 = vcmp.gt.f32.partialorder %v429_v54, 0.0  ;;  %v437_v15 = vmul.f32 0.1, %v429_v54  ;;  %vm434_vm11 = vcmp.gt.f32.partialorder %v430_v27, 0.0  ;;  %v438_v8 = vmul.f32 0.1, %v430_v27  ;;  %p738_p11 = por %p737_p10, %p736_p9 }
  0xf2   :  { %v441_v44 = vsel %vm433_vm10, %v429_v54, %v437_v15  ;;  %v442_v53 = vsel %vm434_vm11, %v430_v27, %v438_v8  ;;  %p739_p12 = pnand %p738_p11, %p732_p8 }
  0xf3   :  { %465 = vmatprep.subr.mxu0 %v441_v44  ;;  %543 = vmatpush1.msra.mxu1 %v442_v53 }
  0xf4   :  { %466 = vmatpush1.msra.mxu0 %v440_v26  ;;  %674 = vmatmul.mubr.msk.f32.vlgmr.msra.gmra.mrb[0].mxu1 %vm458_vm12, %v444_v52 }
  0xf5   :  { %672 = vmatmul.mubr.msk.f32.vlgmr.msra.gmra.mrb[0].mxu0 %vm458_vm12, %v444_v52  ;;  %612 = vmatprep.mubr.f32.mxu1 %v1199_v19 }
  0xf6   :  { %535 = vmatprep.mubr.f32.mxu0 %v1199_v19 }
  0xf8   :  { %675 = vmatmul.mubr.msk.f32.gmra.mrb[2].mxu1 %vm458_vm12, %v445_v32 }
  0xf9   :  { %673 = vmatmul.mubr.msk.f32.gmra.mrb[2].mxu0 %vm458_vm12, %v445_v32 }
 0x1c7   :  { %v608_v37 = vpop.f32.mrb[0].mxu1 }
 0x1c8   :  { %v609_v29 = vadd.f32 %v608_v37, %v451_v18  ;;  %v531_v24 = vpop.f32.mrb[0].mxu0  ;;  %v610_v25 = vpop.f32.mrb[1].mxu1 }
 0x1c9   :  { %v532_v59 = vadd.f32 %v531_v24, %v451_v18  ;;  %v611_v5 = vadd.f32 %v610_v25, %v451_v18  ;;  %v533_v61 = vpop.f32.mrb[1].mxu0 }
 0x1ca   :  { %vm621_vm13 = vcmp.gt.f32.partialorder %v609_v29, 0.0  ;;  %v629_v38 = vmul.f32 0.1, %v609_v29  ;;  %v534_v30 = vadd.f32 %v533_v61, %v451_v18 }
 0x1cb   :  { %vm619_vm14 = vcmp.gt.f32.partialorder %v532_v59, 0.0  ;;  %v627_v34 = vmul.f32 0.1, %v532_v59  ;;  %vm622_vm15 = vcmp.gt.f32.partialorder %v611_v5, 0.0  ;;  %v630_v7 = vmul.f32 0.1, %v611_v5 }
 0x1cc   :  { %v637_v21 = vsel %vm621_vm13, %v609_v29, %v629_v38  ;;  %vm620_vm0 = vcmp.gt.f32.partialorder %v534_v30, 0.0  ;;  %v628_v43 = vmul.f32 0.1, %v534_v30  ;;  %v614_v48 = vpop.f32.mrb[2].mxu1  ;;  %v537_v0 = vpop.f32.mrb[2].mxu0 }
 0x1cd   :  { %645 = vst [vmem:[#allocation5 + $0x10] sm:$0xff] %v637_v21  ;;  %v635_v17 = vsel %vm619_vm14, %v532_v59, %v627_v34  ;;  %v638_v1 = vsel %vm622_vm15, %v611_v5, %v630_v7  ;;  %v615_v2 = vadd.f32 %v614_v48, %v456_v33  ;;  %v538_v13 = vadd.f32 %v537_v0, %v456_v33  ;;  %v616_v14 = vpop.f32.mrb[3].mxu1  ;;  %v539_v31 = vpop.f32.mrb[3].mxu0 }
 0x1ce   :  { %643 = vst [vmem:[#allocation5] sm:$0xff] %v635_v17  ;;  %646 = vst [vmem:[#allocation5 + $0x18] sm:$0xff] %v638_v1  ;;  %v636_v16 = vsel %vm620_vm0, %v534_v30, %v628_v43  ;;  %v617_v42 = vadd.f32 %v616_v14, %v456_v33  ;;  %v540_v63 = vadd.f32 %v539_v31, %v456_v33 }
 0x1cf   :  { %644 = vst [vmem:[#allocation5 + $0x8] sm:$0xff] %v636_v16  ;;  %vm625_vm1 = vcmp.gt.f32.partialorder %v615_v2, 0.0  ;;  %v633_v12 = vmul.f32 0.1, %v615_v2  ;;  %vm623_vm2 = vcmp.gt.f32.partialorder %v538_v13, 0.0 }
 0x1d0   :  { %v631_v40 = vmul.f32 0.1, %v538_v13  ;;  %vm626_vm3 = vcmp.gt.f32.partialorder %v617_v42, 0.0  ;;  %v634_v23 = vmul.f32 0.1, %v617_v42  ;;  %vm624_vm4 = vcmp.gt.f32.partialorder %v540_v63, 0.0 }
 0x1d1   :  { %v632_v58 = vmul.f32 0.1, %v540_v63  ;;  %v641_v20 = vsel %vm625_vm1, %v615_v2, %v633_v12 }
 0x1d2   :  { %v639_v41 = vsel %vm623_vm2, %v538_v13, %v631_v40  ;;  %649 = vst [vmem:[#allocation5 + $0x30] sm:$0xff] %v641_v20  ;;  %v642_v46 = vsel %vm626_vm3, %v617_v42, %v634_v23 }
 0x1d3   :  { %647 = vst [vmem:[#allocation5 + $0x20] sm:$0xff] %v639_v41  ;;  %v640_v47 = vsel %vm624_vm4, %v540_v63, %v632_v58  ;;  %650 = vst [vmem:[#allocation5 + $0x38] sm:$0xff] %v642_v46 }
 0x1d4   :  { %648 = vst [vmem:[#allocation5 + $0x28] sm:$0xff] %v640_v47 }
 0x1d5   :  { %742 = shalt.err (!%p739_p12)
}
 0x1d6   :  { %s743_s16 = scalar_lea.hbm %s1190_s6, 1024 }
 0x1d7   :  { %p744_p13 = scmp.ne.s32.totalorder %s1190_s6, %s743_s16  ;;  %p747_p0 = scmp.lt.u32.totalorder %s743_s16, %s1190_s6 }
 0x1d9   :  { %p749_p1 = pnand %p747_p0, %p744_p13 }
 0x1db   :  { %752 = shalt.err (!%p749_p1)
}
 0x1dc   :  { %662 = dma.vmem_to_hbm [thread:$0]  %s657_s12, 1024, %s1190_s6, [#allocation4], %s758_s7, %s758_s7, %s759_s8  }
 0x1dd   :  { %755 = dma.done.wait [#allocation4], 1024  }
 0x1de   :  { %756 = vsyncadd [#allocation4], 4294966272 }
 0x1df   :  { %666 = vsyncpa [#allocation3], 1 }
 0x1e0   :  { %667 = vsyncpa [#allocation4], 1 }

</bundles_post_ra>
